<compile_context>
chip_gen: v7x
topology: tpu7x:2x2x1
jax: 0.10.0
libtpu: 0.0.40
codegen_flags: <defaults>
</compile_context>

<pallas_src>
import math

import jax
import jax.numpy as jnp
from jax import lax
from jax.experimental import pallas as pl
from jax.experimental.pallas import tpu as pltpu


def _pick_q_tile(nq: int) -> int:
    """Largest lane-aligned Nq tile that still yields >=2 tiles (helps v7x megacore
    and caps the (h, tnq, nk) score intermediate); otherwise the full extent
    (required when nq is not a multiple of 128)."""
    if nq % 128 != 0:
        return nq
    for t in (512, 256, 128):
        if nq % t == 0 and nq // t >= 2:
            return t
    return nq


def _pick_batch_block(bs: int, nq_tiles: int) -> int:
    """Largest batch block (<=8) that keeps >=2 total grid steps when possible."""
    for bb in range(min(bs, 8), 0, -1):
        if bs % bb == 0 and (bs // bb) * nq_tiles >= 2:
            return bb
    for bb in range(min(bs, 8), 0, -1):
        if bs % bb == 0:
            return bb
    return 1


def multi_head_spatial_attention(q, k, v, wq, wk, wv, wo, *, n_heads, dim_head,
                                 compute_dtype=jnp.bfloat16):
    """q: (B, q_c, D, H, W); k: (B, k_c, a, b, c); v: (B, v_c, a, b, c).

    Matches the PyTorch module's forward in eval mode (Dropout is identity,
    Linear layers are bias-free). Weights are given as (in_features, out_features);
    if the module used Identity for out_proj (inner_dim == q_dim), pass
    wo = jnp.eye(inner_dim).
    """
    bs, q_c, d, hh, ww = q.shape
    k_c = k.shape[1]
    v_c = v.shape[1]
    nq = d * hh * ww
    nk = k.shape[2] * k.shape[3] * k.shape[4]
    nv = v.shape[2] * v.shape[3] * v.shape[4]
    assert nk == nv, "k and v must share spatial extent"
    inner_dim = n_heads * dim_head
    assert wq.shape == (q_c, inner_dim) and wk.shape == (k_c, inner_dim)
    assert wv.shape == (v_c, inner_dim) and wo.shape == (inner_dim, q_c)

    out_dtype = q.dtype
    kv_c = k_c + v_c
    inv_scale = 1.0 / math.sqrt(dim_head)

    # ---- wrapper prep: pure reshapes + tiny one-time weight transforms, bf16 ----
    q_cf = q.reshape(bs, q_c, nq).astype(compute_dtype)
    kv_cf = jnp.concatenate(
        [k.reshape(bs, k_c, nk), v.reshape(bs, v_c, nk)], axis=1
    ).astype(compute_dtype)                                     # (bs, k_c+v_c, nk)

    # Q weight with the softmax scale folded in (removes a VALU pass per step).
    wq_t = (wq.T * inv_scale).astype(compute_dtype)             # (inner, q_c)
    # K/V projections fused into one block-diagonal weight -> a single MXU call.
    wkv_t = jnp.zeros((2 * inner_dim, kv_c), compute_dtype)
    wkv_t = wkv_t.at[:inner_dim, :k_c].set(wk.T.astype(compute_dtype))
    wkv_t = wkv_t.at[inner_dim:, k_c:].set(wv.T.astype(compute_dtype))
    wo_t = wo.T.astype(compute_dtype)                           # (q_c, inner)

    # ---- tiling ----
    tnq = _pick_q_tile(nq)
    nq_tiles = nq // tnq
    bb = _pick_batch_block(bs, nq_tiles)
    nb = bs // bb

    def kernel(q_ref, kv_ref, wq_ref, wkv_ref, wo_ref, o_ref):
        tq = q_ref.shape[-1]
        nkk = kv_ref.shape[-1]
        w_q = wq_ref[...]
        w_kv = wkv_ref[...]
        w_o = wo_ref[...]
        for b in range(bb):  # small static unroll over the batch block
            # All-head projections: full-channel contraction, bf16 MXU, f32 accumulation.
            qh = jnp.dot(w_q, q_ref[b], preferred_element_type=jnp.float32)      # (inner, tq)
            kvh = jnp.dot(w_kv, kv_ref[b], preferred_element_type=jnp.float32)   # (2*inner, nk)

            qh = qh.reshape(n_heads, dim_head, tq)
            # One minor-dim transpose (XLU, overlaps MXU), then back to bf16 operands.
            qh_t = jnp.swapaxes(qh, 1, 2).astype(compute_dtype)                  # (h, tq, dh)
            kh = kvh[:inner_dim].astype(compute_dtype).reshape(n_heads, dim_head, nkk)
            vh = kvh[inner_dim:].astype(compute_dtype).reshape(n_heads, dim_head, nkk)

            # scores[h, i, j] = sum_d qh_t[h, i, d] * kh[h, d, j]   (scale pre-folded)
            s = lax.dot_general(
                qh_t, kh,
                dimension_numbers=(((2,), (1,)), ((0,), (0,))),
                preferred_element_type=jnp.float32)                              # (h, tq, nk)

            # Numerically stable softmax over the lane (Nk) axis, f32 math.
            s = s - jnp.max(s, axis=-1, keepdims=True)
            p = jnp.exp(s)
            p = p * pl.reciprocal(jnp.sum(p, axis=-1, keepdims=True), approx=True)

            # out[h, d, i] = sum_j vh[h, d, j] * p[h, i, j]   (transposed-RHS batched)
            oh = lax.dot_general(
                vh, p.astype(compute_dtype),
                dimension_numbers=(((2,), (2,)), ((0,), (0,))),
                preferred_element_type=jnp.float32)                              # (h, dh, tq)
            oh = oh.astype(compute_dtype).reshape(inner_dim, tq)

            # Output projection emitted lane-dense in the final (q_c, Nq) layout.
            o_ref[b] = jnp.dot(w_o, oh,
                               preferred_element_type=jnp.float32).astype(o_ref.dtype)

    # ---- VMEM budget / cost estimate ----
    act_bytes = jnp.dtype(compute_dtype).itemsize
    out_bytes = jnp.dtype(out_dtype).itemsize
    w_bytes = (inner_dim * q_c + 2 * inner_dim * kv_c + q_c * inner_dim) * act_bytes
    blk_bytes = bb * (q_c * tnq * act_bytes + kv_c * nk * act_bytes
                      + q_c * tnq * out_bytes)
    inter_bytes = (2 * inner_dim * tnq * (4 + act_bytes)          # qh/qh_t + oh
                   + 2 * inner_dim * nk * (4 + act_bytes)         # kvh + kh/vh
                   + n_heads * tnq * nk * (8 + act_bytes)         # s, p (f32), p (bf16)
                   + q_c * tnq * 4)
    vmem_est = 2 * (blk_bytes + w_bytes) + inter_bytes            # double-buffered blocks
    try:
        vmem_cap = int(pltpu.get_tpu_info().vmem_capacity_bytes)
    except Exception:
        vmem_cap = 64 << 20                                       # v7x physical (smallest)
    vmem_limit = int(min(max(2 * vmem_est, 32 << 20), int(0.85 * vmem_cap)))

    flops = 2 * bs * (q_c * inner_dim * nq
                      + kv_c * inner_dim * nk
                      + 2 * n_heads * nq * nk * dim_head
                      + inner_dim * q_c * nq)
    transcendentals = bs * n_heads * nq * nk
    bytes_accessed = (act_bytes * bs * (q_c * nq + kv_c * nk) + w_bytes
                      + out_bytes * bs * q_c * nq)

    out_cf = pl.pallas_call(
        kernel,
        out_shape=jax.ShapeDtypeStruct((bs, q_c, nq), out_dtype),
        grid_spec=pltpu.PrefetchScalarGridSpec(
            num_scalar_prefetch=0,
            grid=(nb, nq_tiles),   # batch outer, Nq tiles inner: K/V block stays resident
            in_specs=[
                pl.BlockSpec((bb, q_c, tnq), lambda b, qi: (b, 0, qi)),
                pl.BlockSpec((bb, kv_c, nk), lambda b, qi: (b, 0, 0)),
                pl.BlockSpec((inner_dim, q_c), lambda b, qi: (0, 0)),
                pl.BlockSpec((2 * inner_dim, kv_c), lambda b, qi: (0, 0)),
                pl.BlockSpec((q_c, inner_dim), lambda b, qi: (0, 0)),
            ],
            out_specs=pl.BlockSpec((bb, q_c, tnq), lambda b, qi: (b, 0, qi)),
        ),
        compiler_params=pltpu.CompilerParams(
            dimension_semantics=("parallel", "parallel"),
            vmem_limit_bytes=vmem_limit),
        cost_estimate=pl.CostEstimate(
            flops=flops,
            transcendentals=transcendentals,
            bytes_accessed=bytes_accessed),
    )(q_cf, kv_cf, wq_t, wkv_t, wo_t)

    # TODO(synk): nn.Dropout(p=0.1) in out_proj is eval-mode identity; training-mode
    # stochastic dropout is intentionally omitted.
    # TODO(synk): for very large Nk, stream K/V in Nk tiles with a flash-style
    # online-softmax accumulator to cap VMEM on v7x; this version holds full Nk per step.
    return out_cf.reshape(bs, q_c, d, hh, ww)


def reference(q, k, v, wq, wk, wv, wo, *, n_heads, dim_head):
    """Pure-JAX f32 reference mirroring the PyTorch forward (eval mode)."""
    hi = jax.lax.Precision.HIGHEST
    bs, q_c, d, hh, ww = q.shape
    k_c, v_c = k.shape[1], v.shape[1]
    q_ = q.reshape(bs, q_c, -1).transpose(0, 2, 1)
    k_ = k.reshape(bs, k_c, -1).transpose(0, 2, 1)
    v_ = v.reshape(bs, v_c, -1).transpose(0, 2, 1)
    qp = jnp.einsum("bnc,ci->bni", q_, wq, precision=hi)
    kp = jnp.einsum("bnc,ci->bni", k_, wk, precision=hi)
    vp = jnp.einsum("bnc,ci->bni", v_, wv, precision=hi)

    def split(x):
        b, n, _ = x.shape
        return x.reshape(b, n, n_heads, dim_head).transpose(0, 2, 1, 3)

    qh, kh, vh = map(split, (qp, kp, vp))
    scores = jnp.einsum("bhid,bhjd->bhij", qh, kh, precision=hi) / math.sqrt(dim_head)
    attn = jax.nn.softmax(scores, axis=-1)
    out = jnp.einsum("bhij,bhjd->bhid", attn, vh, precision=hi)
    out = out.transpose(0, 2, 1, 3).reshape(bs, -1, n_heads * dim_head)
    out = jnp.einsum("bni,ic->bnc", out, wo, precision=hi)
    return out.transpose(0, 2, 1).reshape(bs, q_c, d, hh, ww)


if __name__ == "__main__":
    key = jax.random.PRNGKey(0)
    B, q_dim, k_dim, v_dim = 2, 4, 6, 5
    n_heads, dim_head = 2, 16
    inner_dim = n_heads * dim_head
    q_spatial = (2, 4, 4)    # Nq = 32
    kv_spatial = (2, 2, 4)   # Nk = Nv = 16

    ks = jax.random.split(key, 7)
    q = jax.random.normal(ks[0], (B, q_dim) + q_spatial, jnp.float32)
    k = jax.random.normal(ks[1], (B, k_dim) + kv_spatial, jnp.float32)
    v = jax.random.normal(ks[2], (B, v_dim) + kv_spatial, jnp.float32)

    # Deterministic synthetic weights, stored as (in_features, out_features).
    wq = jax.random.normal(ks[3], (q_dim, inner_dim), jnp.float32) * 0.2
    wk = jax.random.normal(ks[4], (k_dim, inner_dim), jnp.float32) * 0.2
    wv = jax.random.normal(ks[5], (v_dim, inner_dim), jnp.float32) * 0.2
    wo = jax.random.normal(ks[6], (inner_dim, q_dim), jnp.float32) * 0.2

    out = multi_head_spatial_attention(
        q, k, v, wq, wk, wv, wo, n_heads=n_heads, dim_head=dim_head)
    out = jax.block_until_ready(out)
    assert out.shape == q.shape, (out.shape, q.shape)

    ref = reference(q, k, v, wq, wk, wv, wo, n_heads=n_heads, dim_head=dim_head)
    max_err = float(jnp.max(jnp.abs(out - ref)))
    # bf16 MXU operands (with f32 accumulation) give ~0.5-1% relative error vs the
    # f32 reference; tolerance sized accordingly.
    if not bool(jnp.allclose(out, ref, rtol=3e-2, atol=3e-2)):
        raise AssertionError(f"Pallas kernel mismatch vs reference, max_err={max_err}")

    print("KERNEL_OK")
</pallas_src>

<mosaic_0001>
module attributes {stable_mosaic.version = 11 : i64} {
  func.func @kernel(%arg0: i32, %arg1: i32, %arg2: memref<1x4x32xbf16, #tpu.memory_space<vmem>>, %arg3: memref<1x11x16xbf16, #tpu.memory_space<vmem>>, %arg4: memref<32x4xbf16, #tpu.memory_space<vmem>>, %arg5: memref<64x11xbf16, #tpu.memory_space<vmem>>, %arg6: memref<4x32xbf16, #tpu.memory_space<vmem>>, %arg7: memref<1x4x32xf32, #tpu.memory_space<vmem>>) attributes {dimension_semantics = [#tpu.dimension_semantics<parallel>, #tpu.dimension_semantics<parallel>], iteration_bounds = array<i64: 2, 1>, scalar_prefetch = 0 : i64, scratch_operands = 0 : i64, tpu.core_type = #tpu.core_type<tc>, window_params = [{transform_indices = @transform_0, window_bounds = array<i64: 1, 4, 32>}, {transform_indices = @transform_1, window_bounds = array<i64: 1, 11, 16>}, {pipeline_mode = #tpu.pipeline_mode<synchronous>, transform_indices = @transform_2, window_bounds = array<i64: 32, 4>}, {pipeline_mode = #tpu.pipeline_mode<synchronous>, transform_indices = @transform_3, window_bounds = array<i64: 64, 11>}, {pipeline_mode = #tpu.pipeline_mode<synchronous>, transform_indices = @transform_4, window_bounds = array<i64: 4, 32>}, {transform_indices = @transform_5, window_bounds = array<i64: 1, 4, 32>}]} {
    %c0 = arith.constant 0 : index
    %c0_0 = arith.constant 0 : index
    %0 = vector.load %arg4[%c0, %c0_0] : memref<32x4xbf16, #tpu.memory_space<vmem>>, vector<32x4xbf16>
    %c0_1 = arith.constant 0 : index
    %c0_2 = arith.constant 0 : index
    %1 = vector.load %arg5[%c0_1, %c0_2] : memref<64x11xbf16, #tpu.memory_space<vmem>>, vector<64x11xbf16>
    %c0_3 = arith.constant 0 : index
    %c0_4 = arith.constant 0 : index
    %2 = vector.load %arg6[%c0_3, %c0_4] : memref<4x32xbf16, #tpu.memory_space<vmem>>, vector<4x32xbf16>
    %c0_5 = arith.constant 0 : index
    %c0_6 = arith.constant 0 : index
    %c0_7 = arith.constant 0 : index
    %3 = vector.load %arg2[%c0_5, %c0_6, %c0_7] : memref<1x4x32xbf16, #tpu.memory_space<vmem>>, vector<1x4x32xbf16>
    %4 = vector.shape_cast %3 : vector<1x4x32xbf16> to vector<4x32xbf16>
    %cst = arith.constant dense<0.000000e+00> : vector<32x32xf32>
    %5 = tpu.matmul %0, %4, %cst {dimension_numbers = #tpu.dot_dimension_numbers<[1], [0], [0], [1], [0, 0, 1, 1], [], []>} : vector<32x4xbf16>, vector<4x32xbf16>, vector<32x32xf32> -> vector<32x32xf32>
    %c0_8 = arith.constant 0 : index
    %c0_9 = arith.constant 0 : index
    %c0_10 = arith.constant 0 : index
    %6 = vector.load %arg3[%c0_8, %c0_9, %c0_10] : memref<1x11x16xbf16, #tpu.memory_space<vmem>>, vector<1x11x16xbf16>
    %7 = vector.shape_cast %6 : vector<1x11x16xbf16> to vector<11x16xbf16>
    %cst_11 = arith.constant dense<0.000000e+00> : vector<64x16xf32>
    %8 = tpu.matmul %1, %7, %cst_11 {dimension_numbers = #tpu.dot_dimension_numbers<[1], [0], [0], [1], [0, 0, 1, 1], [], []>} : vector<64x11xbf16>, vector<11x16xbf16>, vector<64x16xf32> -> vector<64x16xf32>
    %9 = vector.shape_cast %5 : vector<32x32xf32> to vector<2x16x32xf32>
    %10 = tpu.transpose %9, [0, 2, 1] : vector<2x16x32xf32> -> vector<2x32x16xf32>
    %11 = arith.truncf %10 : vector<2x32x16xf32> to vector<2x32x16xbf16>
    %12 = vector.extract_strided_slice %8 {offsets = [0, 0], sizes = [32, 16], strides = [1, 1]} : vector<64x16xf32> to vector<32x16xf32>
    %13 = arith.truncf %12 : vector<32x16xf32> to vector<32x16xbf16>
    %14 = vector.shape_cast %13 : vector<32x16xbf16> to vector<2x16x16xbf16>
    %15 = vector.extract_strided_slice %8 {offsets = [32, 0], sizes = [32, 16], strides = [1, 1]} : vector<64x16xf32> to vector<32x16xf32>
    %16 = arith.truncf %15 : vector<32x16xf32> to vector<32x16xbf16>
    %17 = vector.shape_cast %16 : vector<32x16xbf16> to vector<2x16x16xbf16>
    %cst_12 = arith.constant dense<0.000000e+00> : vector<2x32x16xf32>
    %18 = tpu.matmul %11, %14, %cst_12 {dimension_numbers = #tpu.dot_dimension_numbers<[2], [1], [1], [2], [0, 0, 0, 1, 1, 2], [0], [0]>} : vector<2x32x16xbf16>, vector<2x16x16xbf16>, vector<2x32x16xf32> -> vector<2x32x16xf32>
    %cst_13 = arith.constant dense<0xFF800000> : vector<2x32xf32>
    %19 = vector.multi_reduction <maximumf>, %18, %cst_13 [2] : vector<2x32x16xf32> to vector<2x32xf32>
    %20 = vector.shape_cast %19 : vector<2x32xf32> to vector<2x32x1xf32>
    %21 = vector.broadcast %20 : vector<2x32x1xf32> to vector<2x32x16xf32>
    %22 = arith.subf %18, %21 : vector<2x32x16xf32>
    %23 = math.exp %22 : vector<2x32x16xf32>
    %cst_14 = arith.constant dense<0.000000e+00> : vector<2x32xf32>
    %24 = vector.multi_reduction <add>, %23, %cst_14 [2] : vector<2x32x16xf32> to vector<2x32xf32>
    %25 = vector.shape_cast %24 : vector<2x32xf32> to vector<2x32x1xf32>
    %26 = tpu.reciprocal %25 {approx = true} : vector<2x32x1xf32> -> vector<2x32x1xf32>
    %27 = vector.broadcast %26 : vector<2x32x1xf32> to vector<2x32x16xf32>
    %28 = arith.mulf %23, %27 : vector<2x32x16xf32>
    %29 = arith.truncf %28 : vector<2x32x16xf32> to vector<2x32x16xbf16>
    %cst_15 = arith.constant dense<0.000000e+00> : vector<2x16x32xf32>
    %30 = tpu.matmul %17, %29, %cst_15 {dimension_numbers = #tpu.dot_dimension_numbers<[2], [2], [1], [1], [0, 0, 0, 1, 1, 1], [0], [0]>} : vector<2x16x16xbf16>, vector<2x32x16xbf16>, vector<2x16x32xf32> -> vector<2x16x32xf32>
    %31 = arith.truncf %30 : vector<2x16x32xf32> to vector<2x16x32xbf16>
    %32 = vector.shape_cast %31 : vector<2x16x32xbf16> to vector<32x32xbf16>
    %cst_16 = arith.constant dense<0.000000e+00> : vector<4x32xf32>
    %33 = tpu.matmul %2, %32, %cst_16 {dimension_numbers = #tpu.dot_dimension_numbers<[1], [0], [0], [1], [0, 0, 1, 1], [], []>} : vector<4x32xbf16>, vector<32x32xbf16>, vector<4x32xf32> -> vector<4x32xf32>
    %c0_17 = arith.constant 0 : index
    %c0_18 = arith.constant 0 : index
    %c0_19 = arith.constant 0 : index
    %34 = vector.load %arg7[%c0_17, %c0_18, %c0_19] : memref<1x4x32xf32, #tpu.memory_space<vmem>>, vector<1x4x32xf32>
    %35 = vector.shape_cast %34 : vector<1x4x32xf32> to vector<4x32xf32>
    %36 = vector.shape_cast %33 : vector<4x32xf32> to vector<1x4x32xf32>
    tpu.vector_store %arg7[%c0_17, %c0_18, %c0_19], %36 {strides = array<i32>} : memref<1x4x32xf32, #tpu.memory_space<vmem>>, vector<1x4x32xf32>,
    return
  }
  func.func @transform_0(%arg0: i32, %arg1: i32) -> (i32, i32, i32) {
    %c0_i32 = arith.constant 0 : i32
    %c0_i32_0 = arith.constant 0 : i32
    return %arg0, %c0_i32, %arg1 : i32, i32, i32
  }
  func.func @transform_1(%arg0: i32, %arg1: i32) -> (i32, i32, i32) {
    %c0_i32 = arith.constant 0 : i32
    %c0_i32_0 = arith.constant 0 : i32
    %c0_i32_1 = arith.constant 0 : i32
    return %arg0, %c0_i32, %c0_i32_0 : i32, i32, i32
  }
  func.func @transform_2(%arg0: i32, %arg1: i32) -> (i32, i32) {
    %c0_i32 = arith.constant 0 : i32
    %c0_i32_0 = arith.constant 0 : i32
    %c0_i32_1 = arith.constant 0 : i32
    return %c0_i32, %c0_i32_0 : i32, i32
  }
  func.func @transform_3(%arg0: i32, %arg1: i32) -> (i32, i32) {
    %c0_i32 = arith.constant 0 : i32
    %c0_i32_0 = arith.constant 0 : i32
    %c0_i32_1 = arith.constant 0 : i32
    return %c0_i32, %c0_i32_0 : i32, i32
  }
  func.func @transform_4(%arg0: i32, %arg1: i32) -> (i32, i32) {
    %c0_i32 = arith.constant 0 : i32
    %c0_i32_0 = arith.constant 0 : i32
    %c0_i32_1 = arith.constant 0 : i32
    return %c0_i32, %c0_i32_0 : i32, i32
  }
  func.func @transform_5(%arg0: i32, %arg1: i32) -> (i32, i32, i32) {
    %c0_i32 = arith.constant 0 : i32
    %c0_i32_0 = arith.constant 0 : i32
    return %arg0, %c0_i32, %arg1 : i32, i32, i32
  }
}

</mosaic_0001>

<bundles_post_ra>
// kernel: tpu_custom_call.1
= control target key start
LH: loop header
LB: loop body
LE: loop exit
PB: predicated region body
PF: predicated region fallthrough
CT: control target
= control target key end

     0   :  { %10 = vsyncpa [#allocation3], 0  ;;  %s1484_s0 = inlined_call_operand.vmem [shape: bf16[2,4,32], index: 0, kind: input, shape index: {}]   ;;  %s1485_s1 = inlined_call_operand.vmem [shape: bf16[2,11,16], index: 1, kind: input, shape index: {}]   ;;  %s1486_s2 = inlined_call_operand.vmem [shape: bf16[32,4], index: 2, kind: input, shape index: {}]   ;;  %s1487_s3 = inlined_call_operand.vmem [shape: bf16[64,11], index: 3, kind: input, shape index: {}]   ;;  %s1488_s4 = inlined_call_operand.vmem [shape: bf16[4,32], index: 4, kind: input, shape index: {}]   ;;  %s1489_s5 = inlined_call_operand.hbm [shape: f32[2,4,32], index: 5, kind: output, shape index: {}]  }
   0x1   :  { %12 = vsyncpa [#allocation3 + $0x1], 0  ;;  %s1304_s18 = smov 0   ;;  %s1306_s19 = smov 0  }
   0x2   :  { %s1308_s20 = smov 0   ;;  %s1310_s21 = smov 0  }
   0x3   :  { %s1312_s22 = smov 0   ;;  %s1314_s23 = smov 0  }
   0x4 LB: > { %s983_s24 = sadd.s32 4294967295, %s1268_s23   ;;  %s984_s25 = sadd.s32 4294967294, %s1268_s23   ;;  %s1268_s23 = sphi %s1314_s23, %s18_s23   ;;  %s1264_s22 = sphi %s1312_s22, %s1496_s22   ;;  %s1260_s21 = sphi %s1310_s21, %s1495_s21   ;;  %s1256_s20 = sphi %s1308_s20, %s1494_s20   ;;  %s1252_s19 = sphi %s1306_s19, %s1493_s19   ;;  %s1248_s18 = sphi %s1304_s18, %s1492_s18  }
   0x5   : > { %s30_s26 = sadd.s32 1, %s1264_s22  ;;  %s156_s27 = sadd.s32 1, %s1256_s20 }
   0x6   : > { %p32_p0 = scmp.ge.s32.totalorder %s30_s26, 2  ;;  %p166_p1 = scmp.ne.s32.totalorder %s1256_s20, %s1252_s19 }
   0x7   : > { %p167_p2 = scmp.eq.s32.totalorder %s983_s24, 1  ;;  %p172_p3 = scmp.ne.s32.totalorder %s1252_s19, %s1248_s18 }
   0x8   : > { %s1498_s26 = smov (%p32_p0, %s30_s26), 0  ;;  %p173_p5 = scmp.eq.s32.totalorder %s984_s25, 1 }
   0x9   : > { %p1344_p4 = por %p167_p2, %p166_p1  ;;  %s151_s29 = ssub.s32 %s1264_s22, %s1498_s26 }
   0xa   : > { %p987_p6 = scmp.ge.s32.totalorder %s1268_s23, 1  ;;  %p154_p7 = scmp.eq.s32.totalorder %s151_s29, 0 }
   0xb   : > { %p1351_p8 = por %p173_p5, %p172_p3  ;;  %p218_p9 = scmp.lt.s32.totalorder %s1268_s23, 3 }
   0xc   : > { %s1357_s6 = scalar_select %p154_p7, %s1256_s20, %s156_s27  }
   0xd   : > { %p219_p10 = pnand %p987_p6, %p218_p9 }
   0xe   : > { %p253_p11 = scmp.lt.s32.totalorder (!%p219_p10), %s1260_s21, 1  ;;  %v1151_v0 = vld [vmem:[%s1486_s2] sm:$0xff] (!%p219_p10)   ;;  %vm290_vm0 = vcmask (!%p219_p10), 31744   ;;  %vm390_vm1 = vcmask (!%p219_p10), 1044480   ;;  %vm391_vm2 = vcmask (!%p219_p10), 1045504   ;;  %v1270_v2 = vmov (!%p219_p10), 65535  }
   0xf   : > { %222 = sbr.rel (%p219_p10) target bundleno = 1390 (0x56e), region = 40  ;;  %v1154_v1 = vld [vmem:[%s1487_s3] sm:$0xff] (!%p219_p10)   ;;  %1042 = vmatprep.mubr.msk.bf16.mxu0 (!%p219_p10), %vm290_vm0, %v1151_v0  ;;  %v392_v3 = vsel (!%p219_p10), %vm390_vm1, 4294967295, %v1270_v2  ;;  %vm377_vm3 = vcmask (!%p219_p10), 89088   ;;  %vm297_vm4 = vcmask (!%p219_p10), 1041408   ;;  %v1152_v7 = vld [vmem:[%s1486_s2 + $0x8] sm:$0xff] (!%p219_p10)  }
  0x10   : > { %v393_v4 = vsel (!%p219_p10), %vm391_vm2, %v392_v3, 0  ;;  %1048 = vmatprep.mubr.msk.bf16.mxu1 (!%p219_p10), %vm377_vm3, %v1154_v1  ;;  %v1155_v10 = vld [vmem:[%s1487_s3 + $0x8] sm:$0xff] (!%p219_p10)   ;;  %vm534_vm5 = vcmask (!%p219_p10), 130048   ;;  %v1156_v33 = vld [vmem:[%s1487_s3 + $0x10] sm:$0xff] (!%p219_p10)   ;;  %v1157_v34 = vld [vmem:[%s1487_s3 + $0x18] sm:$0xff] (!%p219_p10)   ;;  %vm1272_vm6 = vmmov (!%p219_p10), 0  }
  0x11   : > { %vm839_vm7 = vcmask (!%p219_p10), 261120   ;;  %s250_s15 = sand.u32 (!%p219_p10), 1, %s1252_s19   ;;  %s1013_s17 = sshll.u32 (!%p219_p10), %s1260_s21, 6  ;;  %vm883_vm8 = vcmask (!%p219_p10), 257024  }
  0x12   : > { %s1437_s7 = scalar_lea.hbm (!%p219_p10), %s1489_s5, %s1013_s17  ;;  %s886_s8 = scalar_lea.sflag (!%p219_p10), [#allocation3], %s250_s15 }
  0x16   : > { %s254_s9 = scalar_select %p253_p11, %s1260_s21, 1 }
  0x17   : > { %s1273_s21 = smov [#allocation2]  }
  0x18   : > { %s989_s12 = sshll.u32 %s254_s9, 1  ;;  %s1016_s13 = sshll.u32 %s254_s9, 3 }
  0x19   : > { %s259_s16 = scalar_lea.vmem %s1484_s0, %s989_s12  ;;  %s264_s25 = scalar_lea.vmem %s1485_s1, %s1016_s13 }
  0x1a   : > { %v279_v5 = vld [vmem:[%s259_s16] sm:$0x3]  ;;  %s988_s16 = sshll.u32 %s250_s15, 2  ;;  %s1194_s10 = sshll.u32 %s1273_s21, 4  ;;  %s1195_s10 = int_to_ptr.vmem [resolvable:$false] %s1194_s10 }
  0x1b   : > { %1092 = vmatprep.subr.msk.bf16.mxu0 %vm297_vm4, %v279_v5  ;;  %v299_v6 = vsel %vm297_vm4, %v279_v5, 0  ;;  %v1153_v8 = vld [vmem:[%s264_s25] sm:$0x3f]   ;;  %s252_s24 = scalar_lea.vmem [#allocation2], %s988_s16  ;;  %s1196_s11 = scalar_lea.vmem %s1195_s10, 128 }
  0x1c   : > { %1041 = vmatpush3.bf16.msra.mxu0 %v299_v6  ;;  %v395_v9 = vand.u32 %v1153_v8, %v393_v4  ;;  %s900_s25 = sshll.u32 %s252_s24, 4  ;;  %s1439_s25 = int_to_ptr.vmem [resolvable:$true] %s900_s25 }
  0x1d   : > { %s1190_s9 = scalar_lea.vmem %s1439_s25, 64  ;;  %p1197_p1 = scmp.lt.s32.totalorder %s1439_s25, %s1195_s10 }
  0x1e   : > { %1046 = vmatprep.subr.bf16.mxu1 %v395_v9  ;;  %p1191_p12 = scmp.ne.s32.totalorder %s1439_s25, %s1190_s9  ;;  %p1198_p2 = scmp.lt.s32.totalorder %s1196_s11, %s1190_s9 }
  0x1f   : > { %1043 = vmatmul.mubr.msk.bf16.vlgmr.msra.gmra.mrb[0].mxu0 %vm290_vm0, %v1152_v7  ;;  %1047 = vmatpush3.bf16.msra.mxu1 %v395_v9 }
  0x20   : > { %p1192_p13 = pnand %p1191_p12, %p1344_p4  ;;  %p1199_p3 = por %p1198_p2, %p1197_p1 }
  0x22   : > { %1049 = vmatmul.mubr.msk.bf16.vlgmr.msra.gmra.mrb[0].mxu1 %vm377_vm3, %v1155_v10  ;;  %p1193_p0 = pneg %p1192_p13 }
  0x23   : > { %1052 = vmatprep.mubr.msk.bf16.mxu1 %vm377_vm3, %v1156_v33 }
  0x24   : > { %p1200_p5 = pnand %p1199_p3, %p1193_p0 }
  0x2a   : > { %1053 = vmatmul.mubr.msk.bf16.gmra.mrb[4].mxu1 %vm377_vm3, %v1157_v34 }
  0xf2   : > { %v1044_v11 = vpop.f32.mrb[0].mxu0 }
  0xf3   : > { %494 = vxpose.xlu1.b32.start [1/2] (short) (narrow) %v1044_v11, 32  ;;  %v335_v12 = vpop.f32.mrb[1].mxu0 }
  0xf4   : > { %462 = vxpose.xlu0.b32.start [1/2] (short) (narrow) %v335_v12, 32  ;;  %v1045_v13 = vpop.f32.mrb[2].mxu0 }
  0xf5   : > { %v338_v14 = vpop.f32.mrb[3].mxu0  ;;  %v1050_v15 = vpop.f32.mrb[0].mxu1 }
  0xf6   : > { %v431_v16 = vpop.f32.mrb[1].mxu1 }
  0xf7   : > { %495 = vxpose.xlu1.b32.end [2/2] (short) (narrow) %v1045_v13, 32  ;;  %v1051_v17 = vpop.f32.mrb[2].mxu1 }
  0xf8   : > { %463 = vxpose.xlu0.b32.end [2/2] (short) (narrow) %v338_v14, 32  ;;  %v531_v18 = vpack.c.bf16 %v1051_v17, %v1050_v15  ;;  %v434_v19 = vpop.f32.mrb[3].mxu1 }
  0xf9   : > { %v530_v20 = vpack.c.bf16 %v434_v19, %v431_v16 }
  0xfb   : > { %1056 = vmatprep.subr.bf16.mxu0 %v530_v20 }
  0xfc   : > { %1057 = vmatpush3.bf16.msra.mxu0 %v530_v20 }
  0xfd   : > { %1062 = vmatprep.subr.bf16.mxu0 %v531_v18 }
 0x173   : > { %v510_v22 = vpop.trf.xlu1 }
 0x174   : > { %v478_v21 = vpop.trf.xlu0 }
 0x177   : > { %v511_v25 = vpop.trf.xlu1 }
 0x178   : > { %v479_v23 = vpop.trf.xlu0  ;;  %v528_v30 = vpack.c.bf16 %v511_v25, %v510_v22 }
 0x179   : > { %v526_v24 = vpack.c.bf16 %v479_v23, %v478_v21 }
 0x17b   : > { %1058 = vmatprep.mubr.msk.bf16.mxu0 %vm534_vm5, %v526_v24  ;;  %v512_v27 = vpop.trf.xlu1 }
 0x17c   : > { %v480_v26 = vpop.trf.xlu0 }
 0x17f   : > { %v513_v31 = vpop.trf.xlu1 }
 0x180   : > { %v481_v28 = vpop.trf.xlu0  ;;  %v529_v32 = vpack.c.bf16 %v513_v31, %v512_v27  ;;  %v1271_v27 = vmov 0.0  }
 0x181   : > { %v527_v29 = vpack.c.bf16 %v481_v28, %v480_v26  ;;  %1068 = vmatprep.subr.bf16.mxu1 %v1271_v27  ;;  %v1054_v28 = vpop.f32.mrb[4].mxu1  ;;  %1072 = vmatprep.mubr.msk.bf16.mxu1 %vm1272_vm6, %v1271_v27 }
 0x183   : > { %1059 = vmatmul.mubr.msk.bf16.vlgmr.msra.gmra.mrb[4].mxu0 %vm534_vm5, %v527_v29  ;;  %v447_v29 = vpop.f32.mrb[5].mxu1 }
 0x184   : > { %1063 = vmatpush3.bf16.msra.mxu0 %v531_v18  ;;  %1064 = vmatprep.mubr.msk.bf16.mxu0 %vm534_vm5, %v528_v30  ;;  %v1055_v30 = vpop.f32.mrb[6].mxu1 }
 0x185   : > { %1076 = vmatprep.subr.bf16.mxu0 %v1271_v27  ;;  %v533_v31 = vpack.c.bf16 %v1055_v30, %v1054_v28 }
 0x18b   : > { %1065 = vmatmul.mubr.msk.bf16.vlgmr.msra.gmra.mrb[8].mxu0 %vm534_vm5, %v529_v32  ;;  %v450_v32 = vpop.f32.mrb[7].mxu1 }
 0x18c   : > { %v532_v33 = vpack.c.bf16 %v450_v32, %v447_v29  ;;  %1080 = vmatprep.mubr.msk.bf16.mxu0 %vm1272_vm6, %v1271_v27 }
 0x256   : > { %v1060_v35 = vpop.f32.mrb[4].mxu0 }
 0x257   : > { %v575_v36 = vpop.f32.mrb[5].mxu0  ;;  %v651_v41 = vsel %vm534_vm5, %v1060_v35, -inf }
 0x258   : > { %v1061_v37 = vpop.f32.mrb[6].mxu0  ;;  %v645_v38 = vsel %vm534_vm5, %v575_v36, -inf }
 0x259   : > { %646 = vmax.xlane.f32.xlu0 %v645_v38  ;;  %v578_v39 = vpop.f32.mrb[7].mxu0  ;;  %v654_v49 = vsel %vm534_vm5, %v1061_v37, -inf }
 0x25a   : > { %v648_v40 = vsel %vm534_vm5, %v578_v39, -inf }
 0x25b   : > { %649 = vmax.xlane.f32.xlu1 %v648_v40 }
 0x25d   : > { %652 = vmax.xlane.f32.xlu0 %v651_v41 }
 0x25e   : > { %v1066_v42 = vpop.f32.mrb[8].mxu0 }
 0x25f   : > { %v630_v43 = vpop.f32.mrb[9].mxu0  ;;  %v663_v44 = vsel %vm534_vm5, %v1066_v42, -inf }
 0x260   : > { %v1067_v45 = vpop.f32.mrb[10].mxu0  ;;  %v657_v46 = vsel %vm534_vm5, %v630_v43, -inf }
 0x261   : > { %664 = vmax.xlane.f32.xlu0 %v663_v44  ;;  %658 = vmax.xlane.f32.xlu1 %v657_v46  ;;  %v633_v47 = vpop.f32.mrb[11].mxu0  ;;  %v666_v50 = vsel %vm534_vm5, %v1067_v45, -inf }
 0x262   : > { %v660_v48 = vsel %vm534_vm5, %v633_v47, -inf }
 0x265   : > { %661 = vmax.xlane.f32.xlu1 %v660_v48 }
 0x269   : > { %655 = vmax.xlane.f32.xlu1 %v654_v49 }
 0x26d   : > { %667 = vmax.xlane.f32.xlu1 %v666_v50 }
 0x2e6   : > { %v647_v51 = vpop.xlane.xlu0 %646 }
 0x2e7   : > { %v669_v52 = vsub.f32 %v575_v36, %v647_v51 }
 0x2e8   : > { %v650_v53 = vpop.xlane.xlu1 %649 }
 0x2e9   : > { %v677_v54 = vmul.f32 1.442695, %v669_v52  ;;  %v670_v55 = vsub.f32 %v578_v39, %v650_v53 }
 0x2ea   : > { %v653_v56 = vpop.xlane.xlu0 %652 }
 0x2eb   : > { %1158 = vpow2.f32 %v677_v54  ;;  %v679_v57 = vmul.f32 1.442695, %v670_v55  ;;  %v671_v58 = vsub.f32 %v1060_v35, %v653_v56 }
 0x2ed   : > { %1160 = vpow2.f32 %v679_v57  ;;  %v681_v63 = vmul.f32 1.442695, %v671_v58 }
 0x2ee   : > { %v659_v59 = vpop.xlane.xlu1 %658  ;;  %v665_v60 = vpop.xlane.xlu0 %664 }
 0x2ef   : > { %v673_v61 = vsub.f32 %v630_v43, %v659_v59  ;;  %v675_v0 = vsub.f32 %v1066_v42, %v665_v60 }
 0x2f1   : > { %v685_v62 = vmul.f32 1.442695, %v673_v61  ;;  %v689_v5 = vmul.f32 1.442695, %v675_v0 }
 0x2f2   : > { %v662_v1 = vpop.xlane.xlu1 %661 }
 0x2f3   : > { %v674_v2 = vsub.f32 %v633_v47, %v662_v1  ;;  %1162 = vpow2.f32 %v685_v62 }
 0x2f4   : > { %1164 = vpow2.f32 %v681_v63 }
 0x2f5   : > { %v1159_v3 = vpop.eup %1158  ;;  %v687_v4 = vmul.f32 1.442695, %v674_v2 }
 0x2f6   : > { %v656_v6 = vpop.xlane.xlu1 %655  ;;  %v693_v7 = vsel %vm534_vm5, %v1159_v3, 0.0 }
 0x2f7   : > { %v1161_v8 = vpop.eup %1160  ;;  %1166 = vpow2.f32 %v687_v4  ;;  %v672_v9 = vsub.f32 %v1061_v37, %v656_v6  ;;  %694 = vadd.xlane.f32.xlu0 %v693_v7 }
 0x2f8   : > { %v696_v10 = vsel %vm534_vm5, %v1161_v8, 0.0  ;;  %1168 = vpow2.f32 %v689_v5 }
 0x2f9   : > { %v683_v11 = vmul.f32 1.442695, %v672_v9  ;;  %697 = vadd.xlane.f32.xlu1 %v696_v10 }
 0x2fa   : > { %v668_v12 = vpop.xlane.xlu1 %667 }
 0x2fb   : > { %1170 = vpow2.f32 %v683_v11  ;;  %v676_v13 = vsub.f32 %v1067_v45, %v668_v12  ;;  %v278_v12 = vld [vmem:[%s1488_s4] sm:$0x3] }
 0x2fd   : > { %v691_v14 = vmul.f32 1.442695, %v676_v13  ;;  %v1163_v15 = vpop.eup %1162 }
 0x2fe   : > { %v705_v16 = vsel %vm534_vm5, %v1163_v15, 0.0  ;;  %v1165_v17 = vpop.eup %1164 }
 0x2ff   : > { %1172 = vpow2.f32 %v691_v14  ;;  %706 = vadd.xlane.f32.xlu0 %v705_v16  ;;  %v699_v20 = vsel %vm534_vm5, %v1165_v17, 0.0 }
 0x301   : > { %v1167_v18 = vpop.eup %1166 }
 0x302   : > { %v708_v19 = vsel %vm534_vm5, %v1167_v18, 0.0  ;;  %v1169_v21 = vpop.eup %1168 }
 0x303   : > { %709 = vadd.xlane.f32.xlu1 %v708_v19  ;;  %700 = vadd.xlane.f32.xlu0 %v699_v20  ;;  %v711_v24 = vsel %vm534_vm5, %v1169_v21, 0.0 }
 0x305   : > { %v1171_v22 = vpop.eup %1170 }
 0x306   : > { %v702_v23 = vsel %vm534_vm5, %v1171_v22, 0.0 }
 0x307   : > { %703 = vadd.xlane.f32.xlu1 %v702_v23  ;;  %712 = vadd.xlane.f32.xlu0 %v711_v24 }
 0x309   : > { %v1173_v25 = vpop.eup %1172 }
 0x30a   : > { %v714_v26 = vsel %vm534_vm5, %v1173_v25, 0.0 }
 0x30b   : > { %715 = vadd.xlane.f32.xlu1 %v714_v26 }
 0x384   : > { %v695_v34 = vpop.xlane.xlu0 %694 }
 0x385   : > { %1174 = vrcp.f32 %v695_v34 }
 0x386   : > { %v698_v35 = vpop.xlane.xlu1 %697 }
 0x387   : > { %1176 = vrcp.f32 %v698_v35 }
 0x38c   : > { %v707_v36 = vpop.xlane.xlu0 %706 }
 0x38d   : > { %1178 = vrcp.f32 %v707_v36 }
 0x38f   : > { %v1175_v37 = vpop.eup %1174 }
 0x390   : > { %v710_v38 = vpop.xlane.xlu1 %709  ;;  %v701_v40 = vpop.xlane.xlu0 %700  ;;  %v725_v41 = vmul.f32 %v1175_v37, %v1159_v3 }
 0x391   : > { %v1177_v39 = vpop.eup %1176  ;;  %1180 = vrcp.f32 %v710_v38 }
 0x392   : > { %v726_v42 = vmul.f32 %v1177_v39, %v1161_v8  ;;  %1182 = vrcp.f32 %v701_v40 }
 0x394   : > { %v704_v43 = vpop.xlane.xlu1 %703  ;;  %v733_v44 = vpack.c.bf16 %v726_v42, %v725_v41  ;;  %v713_v45 = vpop.xlane.xlu0 %712 }
 0x395   : > { %1184 = vrcp.f32 %v704_v43 }
 0x396   : > { %v741_v46 = vsel %vm534_vm5, %v733_v44, 0  ;;  %1186 = vrcp.f32 %v713_v45 }
 0x397   : > { %1069 = vmatpush3.bf16.xpose.msra.mxu1 %v741_v46  ;;  %v1179_v48 = vpop.eup %1178 }
 0x398   : > { %v716_v47 = vpop.xlane.xlu1 %715  ;;  %1070 = vmatprep.subr.bf16.mxu1 %v1271_v27  ;;  %v729_v50 = vmul.f32 %v1179_v48, %v1163_v15 }
 0x399   : > { %1188 = vrcp.f32 %v716_v47 }
 0x39b   : > { %v1181_v49 = vpop.eup %1180 }
 0x39c   : > { %v730_v51 = vmul.f32 %v1181_v49, %v1167_v18  ;;  %v1183_v52 = vpop.eup %1182 }
 0x39d   : > { %v727_v56 = vmul.f32 %v1183_v52, %v1165_v17 }
 0x39e   : > { %v735_v53 = vpack.c.bf16 %v730_v51, %v729_v50 }
 0x39f   : > { %v1185_v54 = vpop.eup %1184 }
 0x3a0   : > { %v791_v55 = vsel %vm534_vm5, %v735_v53, 0  ;;  %v728_v57 = vmul.f32 %v1185_v54, %v1171_v22  ;;  %v1187_v58 = vpop.eup %1186 }
 0x3a1   : > { %1077 = vmatpush3.bf16.xpose.msra.mxu0 %v791_v55  ;;  %v731_v62 = vmul.f32 %v1187_v58, %v1169_v21 }
 0x3a2   : > { %v734_v59 = vpack.c.bf16 %v728_v57, %v727_v56  ;;  %1078 = vmatprep.subr.bf16.mxu0 %v1271_v27 }
 0x3a3   : > { %v1189_v60 = vpop.eup %1188 }
 0x3a4   : > { %v744_v61 = vsel %vm534_vm5, %v734_v59, 0  ;;  %v732_v63 = vmul.f32 %v1189_v60, %v1173_v25 }
 0x3a5   : > { %1071 = vmatpush3.bf16.xpose.msra.mxu1 %v744_v61 }
 0x3a6   : > { %v736_v0 = vpack.c.bf16 %v732_v63, %v731_v62  ;;  %1084 = vmatprep.subr.bf16.mxu1 %v1271_v27 }
 0x3a8   : > { %v794_v1 = vsel %vm534_vm5, %v736_v0, 0 }
 0x3a9   : > { %1079 = vmatpush3.bf16.xpose.msra.mxu0 %v794_v1 }
 0x3ac   : > { %1073 = vmatmul.mubr.msk.bf16.vlgmr.msra.gmra.mrb[8].mxu1 %vm534_vm5, %v532_v33 }
 0x3ad   : > { %1088 = vmatprep.mubr.msk.bf16.mxu1 %vm1272_vm6, %v1271_v27 }
 0x3b0   : > { %1081 = vmatmul.mubr.msk.bf16.vlgmr.msra.gmra.mrb[12].mxu0 %vm534_vm5, %v533_v31 }
 0x47f   : > { %v780_v2 = vpop.f32.mrb[8].mxu1 }
 0x480   : > { %v1074_v3 = vpop.f32.mrb[9].mxu1 }
 0x481   : > { %v783_v4 = vpop.f32.mrb[10].mxu1 }
 0x482   : > { %v837_v5 = vpack.c.bf16 %v783_v4, %v780_v2  ;;  %v1075_v6 = vpop.f32.mrb[11].mxu1 }
 0x483   : > { %v830_v7 = vpop.f32.mrb[12].mxu0 }
 0x484   : > { %v1082_v8 = vpop.f32.mrb[13].mxu0  ;;  %1085 = vmatpush3.bf16.msra.mxu1 %v837_v5 }
 0x485   : > { %v833_v9 = vpop.f32.mrb[14].mxu0  ;;  %1086 = vmatprep.subr.bf16.mxu1 %v1271_v27 }
 0x486   : > { %v838_v10 = vpack.c.bf16 %v833_v9, %v830_v7  ;;  %v1083_v11 = vpop.f32.mrb[15].mxu0 }
 0x488   : > { %1087 = vmatpush3.bf16.msra.mxu1 %v838_v10 }
 0x48b   : > { %1089 = vmatmul.mubr.msk.bf16.vlgmr.msra.gmra.mrb[12].mxu1 %vm839_vm7, %v278_v12 }
 0x55e   : > { %v877_v13 = vpop.f32.mrb[12].mxu1 }
 0x55f   : > { %884 = vst.msk [vmem:[%s252_s24] sm:$0xf] %vm883_vm8, %v877_v13  ;;  %v1090_v14 = vpop.f32.mrb[13].mxu1 }
 0x560   : > { %v880_v15 = vpop.f32.mrb[14].mxu1 }
 0x561   : > { %1203 = shalt.err (!%p1200_p5)
}
 0x562   : > { %s1204_s12 = scalar_lea.hbm %s1437_s7, 64  ;;  %s1208_s15 = scalar_lea.hbm %s1489_s5, 128 }
 0x563   : > { %p1205_p6 = scmp.ne.s32.totalorder %s1437_s7, %s1204_s12  ;;  %p1209_p10 = scmp.lt.u32.totalorder %s1437_s7, %s1489_s5 }
 0x564   : > { %p1210_p11 = scmp.lt.u32.totalorder %s1208_s15, %s1204_s12  ;;  %p1212_p13 = scmp.lt.u32.totalorder %s1204_s12, %s1437_s7 }
 0x565   : > { %p1206_p7 = pnand %p1205_p6, %p1344_p4 }
 0x566   : > { %p1211_p12 = por %p1210_p11, %p1209_p10 }
 0x567   : > { %p1207_p9 = pneg %p1206_p7 }
 0x568   : > { %p1213_p0 = por %p1212_p13, %p1211_p12 }
 0x56a   : > { %p1214_p1 = pnand %p1213_p0, %p1207_p9 }
 0x56c   : > { %1217 = shalt.err (!%p1214_p1)
}
 0x56d   : > { %1093 = dma.vmem_to_hbm [thread:$0]  (%p1344_p4), %s1439_s25, 64, %s1437_s7, %s886_s8   ;;  %v1091_v16 = vpop.f32.mrb[15].mxu1 }
 0x56e PF: > { %p1099_p2 = scmp.ge.s32.totalorder %s1268_s23, 2  ;;  %s912_s24 = sand.u32 1, %s1248_s18  }
 0x56f   : > { %s913_s27 = scalar_lea.sflag [#allocation3], %s912_s24 }
 0x570   : > { %p1096_p3 = pnand %p1099_p2, %p1351_p8 }
 0x572   : > { %1243 = dma.done.wait (!%p1096_p3), %s913_s27, 64  }
 0x573   : > { %1245 = vsyncadd (!%p1096_p3), %s913_s27, 4294967232  ;;  %s18_s23 = sadd.s32 1, %s1268_s23   ;;  %s1492_s18 = smov %s1252_s19 }
 0x574   : > { %p15_p5 = scmp.ge.s32.totalorder %s18_s23, 4   ;;  %s1493_s19 = smov %s1256_s20 }
 0x575   : > { %s1494_s20 = smov %s1357_s6  ;;  %s1495_s21 = smov %s1264_s22 }
 0x576   : > { %s1496_s22 = smov %s1498_s26  ;;  %17 = sbr.rel (!%p15_p5) target bundleno = 4 (0x4), region = 78 }
 0x57d   :  { %918 = vsyncpa [#allocation3], 1 }
 0x57e   :  { %920 = vsyncpa [#allocation3 + $0x1], 1 }

</bundles_post_ra>
